<compile_context>
chip_gen: v7x
topology: tpu7x:2x2x1
jax: 0.10.0
libtpu: 0.0.40
codegen_flags: <defaults>
</compile_context>

<pallas_src>
import functools

import jax
import jax.numpy as jnp
from jax import lax
from jax.experimental import pallas as pl
from jax.experimental.pallas import tpu as pltpu


def _round_up(x, m):
    return ((x + m - 1) // m) * m


def _ntxent_kernel(zr_ref, zc_ref, out_ref, l_sc, t_sc, *,
                   batch, t_row, t_col, temperature):
    i = pl.program_id(0)          # row tile of the sim matrix ("parallel")
    j = pl.program_id(1)          # col tile (reduction axis, "arbitrary")
    two_b = 2 * batch
    inv_t = jnp.float32(1.0 / float(temperature))   # analytic softmax max bound

    @pl.when(j == 0)
    def _():
        l_sc[...] = jnp.zeros_like(l_sc)
        t_sc[...] = jnp.zeros_like(t_sc)

    # sim tile = z_rows . z_cols^T, contraction over the feature dim of both
    # operands (no transpose materialized), bf16/f32 operands, f32 MXU
    # accumulation. (On v5e, verify via pl.lower_as_mlir that this NT-form
    # dot_general does not emit a per-step vxpose of the column block.)
    s = lax.dot_general(zr_ref[...], zc_ref[...],
                        dimension_numbers=(((1,), (1,)), ((), ())),
                        preferred_element_type=jnp.float32)

    # Per-tile global indices — only small iotas offset by program_id.
    row_ids = i * t_row + lax.broadcasted_iota(jnp.int32, (t_row, 1), 0)
    col_g = j * t_col + lax.broadcasted_iota(jnp.int32, (t_row, t_col), 1)

    # Target logit: label(r) = (r + B) mod 2B as a (t_row, 1) vector. Never on
    # the diagonal, so it is extracted from the UN-masked similarities; each
    # row's label lives in exactly one column tile, so the masked sum
    # accumulates it across the j axis.
    lbl = (row_ids + batch) % two_b
    t_sc[...] += jnp.sum(jnp.where(col_g == lbl, s, 0.0), axis=1, keepdims=True)

    # masked_fill(eye(2B), -1e9) + drop padded columns from the softmax.
    neg = jnp.float32(-1e9)
    s = jnp.where((col_g == row_ids) | (col_g >= two_b), neg, s)

    # Online denominator with a STATIC max bound: both operands are
    # unit-norm * (1/sqrt(T)), so |s| <= 1/T and exp(s - 1/T) is in (0, 1]
    # (masked entries underflow to 0). No running max, no rescale.
    l_sc[...] += jnp.sum(jnp.exp(s - inv_t), axis=1, keepdims=True)

    @pl.when(j == pl.num_programs(1) - 1)
    def _():
        per_row = inv_t + jnp.log(l_sc[...]) - t_sc[...]
        # Zero padded rows so the wrapper can just sum and divide by 2B.
        out_ref[...] = jnp.where(row_ids < two_b, per_row, 0.0)


def ntxent_loss(repr_, new_repr, temperature=0.07, *,
                row_tile=512, col_tile=256,
                use_bf16_matmul=True,
                vmem_budget_bytes=48 * 1024 * 1024):
    assert repr_.shape == new_repr.shape and repr_.ndim == 2
    b, d = repr_.shape
    two_b = 2 * b

    mxu_dtype = (jnp.bfloat16 if (use_bf16_matmul or repr_.dtype == jnp.bfloat16)
                 else jnp.float32)
    itemsize = jnp.dtype(mxu_dtype).itemsize
    d_pad = _round_up(d, 128)

    # ---- tile selection ---------------------------------------------------
    rows8 = _round_up(two_b, 8)
    t_col = min(_round_up(int(col_tile), 8), rows8)
    n_col = (two_b + t_col - 1) // t_col          # number of column tiles
    rows_p = n_col * t_col                        # padded row count

    # Row tile = r * t_col (so it divides rows_p), as large as the VMEM budget
    # allows — only t_row sets HBM traffic — but keep >= 2 row tiles whenever
    # possible so the "parallel" axis shards across both v7x TensorCores.
    r_max = max(1, int(row_tile) // t_col)
    if n_col >= 2:
        r_max = min(r_max, max(1, n_col // 2))

    def _fits(r):
        blk = 2 * (r * t_col + t_col) * d_pad * itemsize   # double-buffered inputs
        return blk <= vmem_budget_bytes

    r = max(1, min(r_max, n_col))
    while r > 1 and (n_col % r != 0 or not _fits(r)):
        r -= 1
    t_row = r * t_col
    n_row = rows_p // t_row

    # ---- pre-normalize once (f32 math, 1/sqrt(T) folded), pad, cast --------
    z = jnp.concatenate([repr_, new_repr], axis=0).astype(jnp.float32)
    sumsq = jnp.sum(z * z, axis=1, keepdims=True)
    inv_norm = lax.rsqrt(jnp.maximum(sumsq, 1e-24))        # == 1/max(||x||,1e-12)
    zn = z * (inv_norm * jnp.float32(1.0 / (float(temperature) ** 0.5)))
    zn = jnp.pad(zn, ((0, rows_p - two_b), (0, d_pad - d))).astype(mxu_dtype)

    kernel = functools.partial(_ntxent_kernel, batch=b, t_row=t_row,
                               t_col=t_col, temperature=float(temperature))

    # Bytes: column blocks are re-streamed once per row tile; row blocks once.
    cost = pl.CostEstimate(
        flops=2 * rows_p * rows_p * d_pad,
        transcendentals=rows_p * rows_p + rows_p,
        bytes_accessed=(n_row * rows_p * d_pad + rows_p * d_pad) * itemsize
                       + rows_p * 4,
    )

    # Explicit VMEM limit: double-buffered inputs + lane-padded (t,1) columns.
    in_vmem = 2 * (t_row + t_col) * d_pad * itemsize
    col_vmem = 4 * t_row * 128 * 4
    vmem_limit = max(32 << 20,
                     min(in_vmem + col_vmem + (4 << 20),
                         int(vmem_budget_bytes) + (16 << 20)))

    per_row = pl.pallas_call(
        kernel,
        out_shape=jax.ShapeDtypeStruct((rows_p, 1), jnp.float32),
        grid_spec=pltpu.PrefetchScalarGridSpec(
            num_scalar_prefetch=0,
            grid=(n_row, n_col),
            in_specs=[
                pl.BlockSpec((t_row, d_pad), lambda i, j: (i, 0)),  # row block
                pl.BlockSpec((t_col, d_pad), lambda i, j: (j, 0)),  # col block
            ],
            out_specs=pl.BlockSpec((t_row, 1), lambda i, j: (i, 0)),
            scratch_shapes=[
                pltpu.VMEM((t_row, 1), jnp.float32),   # running sum-exp
                pltpu.VMEM((t_row, 1), jnp.float32),   # target-logit accumulator
            ],
        ),
        compiler_params=pltpu.CompilerParams(
            dimension_semantics=("parallel", "arbitrary"),
            vmem_limit_bytes=int(vmem_limit)),
        cost_estimate=cost,
    )(zn, zn)

    return jnp.sum(per_row) / two_b


def _ntxent_ref(repr_, new_repr, temperature=0.07):
    # Pure-JAX reference mirroring the PyTorch module.
    b = repr_.shape[0]
    eps = 1e-12
    r = repr_ / jnp.maximum(jnp.linalg.norm(repr_, axis=1, keepdims=True), eps)
    n = new_repr / jnp.maximum(jnp.linalg.norm(new_repr, axis=1, keepdims=True), eps)
    z = jnp.concatenate([r, n], axis=0)
    sim = (z @ z.T) / temperature
    mask = jnp.eye(2 * b, dtype=bool)
    sim = jnp.where(mask, -1e9, sim)
    labels = jnp.concatenate([jnp.arange(b) + b, jnp.arange(b)])
    logp = sim - jax.scipy.special.logsumexp(sim, axis=1, keepdims=True)
    return -jnp.mean(logp[jnp.arange(2 * b), labels])


if __name__ == "__main__":
    key = jax.random.PRNGKey(0)
    k1, k2, k3, k4 = jax.random.split(key, 4)

    # Case 1: small single-tile problem, exact f32 MXU path (tight tolerance).
    b1, d1 = 8, 32
    r1 = jax.random.normal(k1, (b1, d1), dtype=jnp.float32)
    n1 = jax.random.normal(k2, (b1, d1), dtype=jnp.float32)
    loss1 = jax.block_until_ready(
        ntxent_loss(r1, n1, temperature=0.07, use_bf16_matmul=False))
    ref1 = _ntxent_ref(r1, n1, temperature=0.07)
    assert jnp.allclose(loss1, ref1, atol=1e-4, rtol=1e-4), (loss1, ref1)

    # Case 2: multi-tile grid with row + feature padding, f32 path
    # (exercises the static-max LSE tiling and per-tile masks exactly).
    b2, d2 = 90, 72
    r2 = jax.random.normal(k3, (b2, d2), dtype=jnp.float32)
    n2 = jax.random.normal(k4, (b2, d2), dtype=jnp.float32)
    ref2 = _ntxent_ref(r2, n2, temperature=0.07)
    loss2_f32 = jax.block_until_ready(
        ntxent_loss(r2, n2, temperature=0.07, row_tile=128, col_tile=64,
                    use_bf16_matmul=False))
    assert jnp.allclose(loss2_f32, ref2, atol=1e-4, rtol=1e-4), (loss2_f32, ref2)

    # Case 3: same multi-tile grid on the default bf16-MXU path; tolerance
    # accounts for bf16 rounding of ~1/T-scale logits.
    loss2_bf16 = jax.block_until_ready(
        ntxent_loss(r2, n2, temperature=0.07, row_tile=128, col_tile=64))
    assert jnp.allclose(loss2_bf16, ref2, atol=5e-2, rtol=2e-2), (loss2_bf16, ref2)

    print("KERNEL_OK")
</pallas_src>

<mosaic_0001>
module attributes {stable_mosaic.version = 11 : i64} {
  func.func @_ntxent_kernel(%arg0: i32, %arg1: i32, %arg2: memref<16x128xf32, #tpu.memory_space<vmem>>, %arg3: memref<16x128xf32, #tpu.memory_space<vmem>>, %arg4: memref<16x1xf32, #tpu.memory_space<vmem>>, %arg5: memref<16x1xf32, #tpu.memory_space<vmem>>, %arg6: memref<16x1xf32, #tpu.memory_space<vmem>>) attributes {dimension_semantics = [#tpu.dimension_semantics<parallel>, #tpu.dimension_semantics<arbitrary>], iteration_bounds = array<i64: 1, 1>, scalar_prefetch = 0 : i64, scratch_operands = 2 : i64, tpu.core_type = #tpu.core_type<tc>, window_params = [{transform_indices = @transform_0, window_bounds = array<i64: 16, 128>}, {transform_indices = @transform_1, window_bounds = array<i64: 16, 128>}, {transform_indices = @transform_2, window_bounds = array<i64: 16, 1>}]} {
    %c0_i32 = arith.constant 0 : i32
    %0 = arith.cmpi eq, %arg1, %c0_i32 : i32
    %1 = arith.extui %0 : i1 to i32
    %c0_i32_0 = arith.constant 0 : i32
    %2 = arith.cmpi ne, %1, %c0_i32_0 : i32
    scf.if %2 {
      %cst_27 = arith.constant 0.000000e+00 : f32
      %59 = vector.broadcast %cst_27 : f32 to vector<16x1xf32>
      %c0_28 = arith.constant 0 : index
      %c0_29 = arith.constant 0 : index
      %60 = vector.load %arg5[%c0_28, %c0_29] : memref<16x1xf32, #tpu.memory_space<vmem>>, vector<16x1xf32>
      tpu.vector_store %arg5[%c0_28, %c0_29], %59 {strides = array<i32>} : memref<16x1xf32, #tpu.memory_space<vmem>>, vector<16x1xf32>,
      %cst_30 = arith.constant 0.000000e+00 : f32
      %61 = vector.broadcast %cst_30 : f32 to vector<16x1xf32>
      %c0_31 = arith.constant 0 : index
      %c0_32 = arith.constant 0 : index
      %62 = vector.load %arg6[%c0_31, %c0_32] : memref<16x1xf32, #tpu.memory_space<vmem>>, vector<16x1xf32>
      tpu.vector_store %arg6[%c0_31, %c0_32], %61 {strides = array<i32>} : memref<16x1xf32, #tpu.memory_space<vmem>>, vector<16x1xf32>,
    } else {
    }
    %c0 = arith.constant 0 : index
    %c0_1 = arith.constant 0 : index
    %3 = vector.load %arg2[%c0, %c0_1] : memref<16x128xf32, #tpu.memory_space<vmem>>, vector<16x128xf32>
    %c0_2 = arith.constant 0 : index
    %c0_3 = arith.constant 0 : index
    %4 = vector.load %arg3[%c0_2, %c0_3] : memref<16x128xf32, #tpu.memory_space<vmem>>, vector<16x128xf32>
    %cst = arith.constant dense<0.000000e+00> : vector<16x16xf32>
    %5 = tpu.matmul %3, %4, %cst {dimension_numbers = #tpu.dot_dimension_numbers<[1], [1], [0], [0], [0, 0, 1, 0], [], []>} : vector<16x128xf32>, vector<16x128xf32>, vector<16x16xf32> -> vector<16x16xf32>
    %c16_i32 = arith.constant 16 : i32
    %6 = arith.muli %arg0, %c16_i32 : i32
    %7 = tpu.iota {dimensions = array<i32: 0>} : vector<16x1xi32>
    %8 = vector.broadcast %6 : i32 to vector<16x1xi32>
    %9 = arith.addi %8, %7 : vector<16x1xi32>
    %c16_i32_4 = arith.constant 16 : i32
    %10 = arith.muli %arg1, %c16_i32_4 : i32
    %11 = tpu.iota {dimensions = array<i32: 1>} : vector<16x16xi32>
    %12 = vector.broadcast %10 : i32 to vector<16x16xi32>
    %13 = arith.addi %12, %11 : vector<16x16xi32>
    %c8_i32 = arith.constant 8 : i32
    %14 = vector.broadcast %c8_i32 : i32 to vector<16x1xi32>
    %15 = arith.addi %9, %14 : vector<16x1xi32>
    %c16_i32_5 = arith.constant 16 : i32
    %c0_i32_6 = arith.constant 0 : i32
    %16 = arith.cmpi eq, %c16_i32_5, %c0_i32_6 : i32
    %c1_i32 = arith.constant 1 : i32
    %17 = arith.select %16, %c1_i32, %c16_i32_5 : i32
    %18 = vector.broadcast %17 : i32 to vector<16x1xi32>
    %19 = arith.remsi %15, %18 : vector<16x1xi32>
    %c0_i32_7 = arith.constant 0 : i32
    %20 = vector.broadcast %c0_i32_7 : i32 to vector<16x1xi32>
    %21 = arith.cmpi ne, %19, %20 : vector<16x1xi32>
    %c0_i32_8 = arith.constant 0 : i32
    %22 = vector.broadcast %c0_i32_8 : i32 to vector<16x1xi32>
    %23 = arith.cmpi slt, %19, %22 : vector<16x1xi32>
    %c0_i32_9 = arith.constant 0 : i32
    %24 = arith.cmpi slt, %17, %c0_i32_9 : i32
    %25 = vector.broadcast %24 : i1 to vector<16x1xi1>
    %26 = vector.broadcast %25 : vector<16x1xi1> to vector<16x1xi1>
    %27 = arith.xori %23, %26 : vector<16x1xi1>
    %28 = arith.andi %27, %21 : vector<16x1xi1>
    %29 = vector.broadcast %17 : i32 to vector<16x1xi32>
    %30 = arith.addi %19, %29 : vector<16x1xi32>
    %31 = arith.select %28, %30, %19 : vector<16x1xi1>, vector<16x1xi32>
    %c0_10 = arith.constant 0 : index
    %c0_11 = arith.constant 0 : index
    %32 = vector.load %arg6[%c0_10, %c0_11] : memref<16x1xf32, #tpu.memory_space<vmem>>, vector<16x1xf32>
    %33 = vector.broadcast %31 : vector<16x1xi32> to vector<16x16xi32>
    %34 = arith.cmpi eq, %13, %33 : vector<16x16xi32>
    %cst_12 = arith.constant 0.000000e+00 : f32
    %35 = vector.broadcast %cst_12 : f32 to vector<16x16xf32>
    %36 = arith.select %34, %5, %35 : vector<16x16xi1>, vector<16x16xf32>
    %cst_13 = arith.constant dense<0.000000e+00> : vector<16xf32>
    %37 = vector.multi_reduction <add>, %36, %cst_13 [1] : vector<16x16xf32> to vector<16xf32>
    %38 = vector.shape_cast %37 : vector<16xf32> to vector<16x1xf32>
    %39 = arith.addf %32, %38 : vector<16x1xf32>
    %c0_14 = arith.constant 0 : index
    %c0_15 = arith.constant 0 : index
    %40 = vector.load %arg6[%c0_14, %c0_15] : memref<16x1xf32, #tpu.memory_space<vmem>>, vector<16x1xf32>
    tpu.vector_store %arg6[%c0_14, %c0_15], %39 {strides = array<i32>} : memref<16x1xf32, #tpu.memory_space<vmem>>, vector<16x1xf32>,
    %41 = vector.broadcast %9 : vector<16x1xi32> to vector<16x16xi32>
    %42 = arith.cmpi eq, %13, %41 : vector<16x16xi32>
    %c16_i32_16 = arith.constant 16 : i32
    %43 = vector.broadcast %c16_i32_16 : i32 to vector<16x16xi32>
    %44 = arith.cmpi sge, %13, %43 : vector<16x16xi32>
    %45 = arith.ori %42, %44 : vector<16x16xi1>
    %cst_17 = arith.constant -1.000000e+09 : f32
    %46 = vector.broadcast %cst_17 : f32 to vector<16x16xf32>
    %47 = arith.select %45, %46, %5 : vector<16x16xi1>, vector<16x16xf32>
    %c0_18 = arith.constant 0 : index
    %c0_19 = arith.constant 0 : index
    %48 = vector.load %arg5[%c0_18, %c0_19] : memref<16x1xf32, #tpu.memory_space<vmem>>, vector<16x1xf32>
    %cst_20 = arith.constant 14.2857141 : f32
    %49 = vector.broadcast %cst_20 : f32 to vector<16x16xf32>
    %50 = arith.subf %47, %49 : vector<16x16xf32>
    %51 = math.exp %50 : vector<16x16xf32>
    %cst_21 = arith.constant dense<0.000000e+00> : vector<16xf32>
    %52 = vector.multi_reduction <add>, %51, %cst_21 [1] : vector<16x16xf32> to vector<16xf32>
    %53 = vector.shape_cast %52 : vector<16xf32> to vector<16x1xf32>
    %54 = arith.addf %48, %53 : vector<16x1xf32>
    %c0_22 = arith.constant 0 : index
    %c0_23 = arith.constant 0 : index
    %55 = vector.load %arg5[%c0_22, %c0_23] : memref<16x1xf32, #tpu.memory_space<vmem>>, vector<16x1xf32>
    tpu.vector_store %arg5[%c0_22, %c0_23], %54 {strides = array<i32>} : memref<16x1xf32, #tpu.memory_space<vmem>>, vector<16x1xf32>,
    %c0_i32_24 = arith.constant 0 : i32
    %56 = arith.cmpi eq, %arg1, %c0_i32_24 : i32
    %57 = arith.extui %56 : i1 to i32
    %cst_25 = arith.constant 14.2857141 : f32
    %c0_i32_26 = arith.constant 0 : i32
    %58 = arith.cmpi ne, %57, %c0_i32_26 : i32
    scf.if %58 {
      %c0_27 = arith.constant 0 : index
      %c0_28 = arith.constant 0 : index
      %59 = vector.load %arg5[%c0_27, %c0_28] : memref<16x1xf32, #tpu.memory_space<vmem>>, vector<16x1xf32>
      %60 = math.log %59 : vector<16x1xf32>
      %61 = vector.broadcast %cst_25 : f32 to vector<16x1xf32>
      %62 = arith.addf %61, %60 : vector<16x1xf32>
      %c0_29 = arith.constant 0 : index
      %c0_30 = arith.constant 0 : index
      %63 = vector.load %arg6[%c0_29, %c0_30] : memref<16x1xf32, #tpu.memory_space<vmem>>, vector<16x1xf32>
      %64 = arith.subf %62, %63 : vector<16x1xf32>
      %c16_i32_31 = arith.constant 16 : i32
      %65 = vector.broadcast %c16_i32_31 : i32 to vector<16x1xi32>
      %66 = arith.cmpi slt, %9, %65 : vector<16x1xi32>
      %cst_32 = arith.constant 0.000000e+00 : f32
      %67 = vector.broadcast %cst_32 : f32 to vector<16x1xf32>
      %68 = arith.select %66, %64, %67 : vector<16x1xi1>, vector<16x1xf32>
      %c0_33 = arith.constant 0 : index
      %c0_34 = arith.constant 0 : index
      %69 = vector.load %arg4[%c0_33, %c0_34] : memref<16x1xf32, #tpu.memory_space<vmem>>, vector<16x1xf32>
      tpu.vector_store %arg4[%c0_33, %c0_34], %68 {strides = array<i32>} : memref<16x1xf32, #tpu.memory_space<vmem>>, vector<16x1xf32>,
    } else {
    }
    return
  }
  func.func @transform_0(%arg0: i32, %arg1: i32) -> (i32, i32) {
    %c0_i32 = arith.constant 0 : i32
    %c0_i32_0 = arith.constant 0 : i32
    return %arg0, %c0_i32 : i32, i32
  }
  func.func @transform_1(%arg0: i32, %arg1: i32) -> (i32, i32) {
    %c0_i32 = arith.constant 0 : i32
    %c0_i32_0 = arith.constant 0 : i32
    return %arg1, %c0_i32 : i32, i32
  }
  func.func @transform_2(%arg0: i32, %arg1: i32) -> (i32, i32) {
    %c0_i32 = arith.constant 0 : i32
    %c0_i32_0 = arith.constant 0 : i32
    return %arg0, %c0_i32 : i32, i32
  }
}

</mosaic_0001>

<bundles_post_ra>
// kernel: tpu_custom_call.1
= control target key start
LH: loop header
LB: loop body
LE: loop exit
PB: predicated region body
PF: predicated region fallthrough
CT: control target
= control target key end

     0   :  { %7 = vsyncpa [#allocation5], 0  ;;  %s377_s0 = inlined_call_operand.hbm [shape: f32[16,128], index: 0, kind: input, shape index: {}]   ;;  %s378_s1 = inlined_call_operand.hbm [shape: f32[16,128], index: 1, kind: input, shape index: {}]   ;;  %s379_s2 = inlined_call_operand.vmem [shape: f32[16,1], index: 2, kind: output, shape index: {}]  }
   0x1   :  { %8 = vsyncpa [#allocation7], 0  ;;  %s313_s9 = smov [#allocation4]   ;;  %s265_s13 = scalar_lea.hbm %s377_s0, 256 }
   0x2   :  { %s14_s10 = sshll.u32 %s313_s9, 4  ;;  %p266_p0 = scmp.ne.s32.totalorder %s377_s0, %s265_s13  ;;  %s15_s10 = int_to_ptr.vmem [resolvable:$true] %s14_s10 }
   0x3   :  { %p269_p1 = scmp.lt.u32.totalorder %s265_s13, %s377_s0 }
   0x5   :  { %p271_p2 = pnand %p269_p1, %p266_p0 }
   0x7   :  { %274 = shalt.err (!%p271_p2)
}
   0x8   :  { %s275_s18 = scalar_lea.vmem %s15_s10, 256  ;;  %p280_p4 = scmp.lt.s32.totalorder %s15_s10, %s15_s10 }
   0x9   :  { %p276_p3 = scmp.ne.s32.totalorder %s15_s10, %s275_s18  ;;  %p281_p5 = scmp.lt.s32.totalorder %s275_s18, %s275_s18 }
   0xb   :  { %p282_p6 = por %p281_p5, %p280_p4 }
   0xd   :  { %p283_p7 = pnand %p282_p6, %p276_p3 }
   0xf   :  { %286 = shalt.err (!%p283_p7)
}
  0x10   :  { %s314_s19 = smov 128   ;;  %s315_s20 = smov 8  }
  0x11   :  { %20 = dma.hbm_to_vmem [thread:$0]  %s377_s0, 256, %s15_s10, [#allocation5], %s314_s19, %s314_s19, %s315_s20  }
  0x12   :  { %s316_s23 = smov [#allocation6]   ;;  %s287_s27 = scalar_lea.hbm %s378_s1, 256 }
  0x13   :  { %s26_s24 = sshll.u32 %s316_s23, 4  ;;  %p288_p8 = scmp.ne.s32.totalorder %s378_s1, %s287_s27  ;;  %s27_s24 = int_to_ptr.vmem [resolvable:$true] %s26_s24 }
  0x14   :  { %p291_p9 = scmp.lt.u32.totalorder %s287_s27, %s378_s1 }
  0x16   :  { %p293_p10 = pnand %p291_p9, %p288_p8 }
  0x18   :  { %296 = shalt.err (!%p293_p10)
}
  0x19   :  { %s297_s4 = scalar_lea.vmem %s27_s24, 256  ;;  %p302_p12 = scmp.lt.s32.totalorder %s27_s24, %s27_s24 }
  0x1a   :  { %p298_p11 = scmp.ne.s32.totalorder %s27_s24, %s297_s4  ;;  %p303_p13 = scmp.lt.s32.totalorder %s297_s4, %s297_s4 }
  0x1c   :  { %p304_p0 = por %p303_p13, %p302_p12 }
  0x1e   :  { %p305_p1 = pnand %p304_p0, %p298_p11 }
  0x20   :  { %308 = shalt.err (!%p305_p1)
}
  0x21   :  { %32 = dma.hbm_to_vmem [thread:$0]  %s378_s1, 256, %s27_s24, [#allocation7], %s314_s19, %s314_s19, %s315_s20  }
  0x22   :  { %309 = dma.done.wait [#allocation5], 256  }
  0x23   :  { %310 = vsyncadd [#allocation5], 4294967040 }
  0x24   :  { %311 = dma.done.wait [#allocation7], 256  }
  0x25   :  { %312 = vsyncadd [#allocation7], 4294967040  ;;  %v50_v0 = vld [vmem:[#allocation6] sm:$0xff]  ;;  %v51_v1 = vld [vmem:[#allocation6 + $0x8] sm:$0xff]  ;;  %vm43_vm0 = vcmask 7168   ;;  %v317_v5 = vmov 0.0   ;;  %v128_v6 = vlaneseq }
  0x26   :  { %v48_v2 = vld [vmem:[#allocation4] sm:$0xff]  ;;  %v248_v3 = vpack.c.bf16 %v51_v1, %v50_v0  ;;  %v49_v4 = vld [vmem:[#allocation4 + $0x8] sm:$0xff]  ;;  %46 = vst.msk [vmem:[#allocation3] sm:$0xff] %vm43_vm0, %v317_v5  ;;  %44 = vst.msk [vmem:[#allocation2] sm:$0xff] %vm43_vm0, %v317_v5  ;;  %vm171_vm7 = vcmask 130048  }
  0x27   :  { %245 = vmatprep.mubr.f32.mxu0 %v48_v2  ;;  %45 = vst.msk [vmem:[#allocation2 + $0x8] sm:$0xff] %vm43_vm0, %v317_v5  ;;  %47 = vst.msk [vmem:[#allocation3 + $0x8] sm:$0xff] %vm43_vm0, %v317_v5  ;;  %v129_v7 = vshrl.u32 %v128_v6, 7  ;;  %v136_v9 = vand.u32 127, %v128_v6 }
  0x28   :  { %249 = vmatprep.subr.bf16.mxu0 %v248_v3 }
  0x29   :  { %251 = vmatpush3.bf16.xpose.msra.mxu0 %v248_v3  ;;  %v130_v8 = vadd.s32 8, %v129_v7  ;;  %vm185_vm2 = vcmp.ge.s32.totalorder %v136_v9, 16  ;;  %vm183_vm3 = vcmp.eq.s32.totalorder %v136_v9, %v129_v7 }
  0x2a   :  { %vm186_vm6 = vmor %vm183_vm3, %vm185_vm2 }
  0x2b   :  { %v140_v10 = vadd.s32 8, %v130_v8  ;;  %vm184_vm1 = vcmp.eq.s32.totalorder %v136_v9, %v130_v8  ;;  %v145_v11 = vand.u32 15, %v130_v8 }
  0x2c   :  { %vm187_vm4 = vmor %vm184_vm1, %vm185_vm2 }
  0x2d   :  { %v152_v12 = vand.u32 15, %v140_v10  ;;  %vm167_vm5 = vcmp.eq.s32.totalorder %v136_v9, %v145_v11  ;;  %v165_v29 = vld [vmem:[#allocation3] sm:$0xff]  ;;  %v190_v35 = vld [vmem:[#allocation2] sm:$0xff] }
  0x2e   :  { %v166_v32 = vld [vmem:[#allocation3 + $0x8] sm:$0xff]  ;;  %v191_v38 = vld [vmem:[#allocation2 + $0x8] sm:$0xff] }
  0x2f   :  { %vm168_vm8 = vcmp.eq.s32.totalorder %v136_v9, %v152_v12 }
  0x30   :  { %246 = vmatmul.mubr.f32.vlgmr.msra.gmra.mrb[0].mxu0 %v49_v4 }
 0x103   :  { %v247_v13 = vpop.f32.mrb[0].mxu0 }
 0x104   :  { %v189_v14 = vsel %vm187_vm4, -1e+09, %v247_v13  ;;  %v118_v15 = vpop.f32.mrb[1].mxu0  ;;  %v170_v21 = vsel %vm168_vm8, %v247_v13, 0.0 }
 0x105   :  { %v236_v16 = vadd.f32 -14.285714, %v189_v14  ;;  %v169_v17 = vsel %vm167_vm5, %v118_v15, 0.0  ;;  %v188_v18 = vsel %vm186_vm6, -1e+09, %v118_v15  ;;  %v175_v24 = vsel %vm171_vm7, %v170_v21, 0.0 }
 0x106   :  { %v235_v19 = vadd.f32 -14.285714, %v188_v18  ;;  %v172_v20 = vsel %vm171_vm7, %v169_v17, 0.0 }
 0x107   :  { %173 = vadd.xlane.f32.xlu1 %v172_v20  ;;  %v196_v22 = vmul.f32 1.442695, %v236_v16 }
 0x108   :  { %v194_v23 = vmul.f32 1.442695, %v235_v19 }
 0x10a   :  { %257 = vpow2.f32 %v194_v23 }
 0x10b   :  { %176 = vadd.xlane.f32.xlu1 %v175_v24  ;;  %259 = vpow2.f32 %v196_v22 }
 0x114   :  { %v258_v25 = vpop.eup %257 }
 0x115   :  { %v198_v26 = vsel %vm171_vm7, %v258_v25, 0.0  ;;  %v260_v27 = vpop.eup %259 }
 0x116   :  { %199 = vadd.xlane.f32.xlu0 %v198_v26  ;;  %v201_v28 = vsel %vm171_vm7, %v260_v27, 0.0 }
 0x11a   :  { %202 = vadd.xlane.f32.xlu0 %v201_v28 }
 0x194   :  { %v174_v30 = vpop.xlane.xlu1 %173 }
 0x195   :  { %v178_v31 = vadd.f32 %v174_v30, %v165_v29 }
 0x197   :  { %181 = vst.msk [vmem:[#allocation3] sm:$0xff] %vm43_vm0, %v178_v31 }
 0x198   :  { %v177_v33 = vpop.xlane.xlu1 %176 }
 0x199   :  { %v179_v34 = vadd.f32 %v177_v33, %v166_v32 }
 0x19b   :  { %182 = vst.msk [vmem:[#allocation3 + $0x8] sm:$0xff] %vm43_vm0, %v179_v34 }
 0x19e   :  { %v219_v47 = vld [vmem:[#allocation3] sm:$0xff] }
 0x1a2   :  { %v220_v51 = vld [vmem:[#allocation3 + $0x8] sm:$0xff] }
 0x1a3   :  { %v200_v36 = vpop.xlane.xlu0 %199 }
 0x1a4   :  { %v204_v37 = vadd.f32 %v200_v36, %v190_v35 }
 0x1a6   :  { %206 = vst.msk [vmem:[#allocation2] sm:$0xff] %vm43_vm0, %v204_v37 }
 0x1a7   :  { %v203_v39 = vpop.xlane.xlu0 %202 }
 0x1a8   :  { %v205_v40 = vadd.f32 %v203_v39, %v191_v38 }
 0x1aa   :  { %207 = vst.msk [vmem:[#allocation2 + $0x8] sm:$0xff] %vm43_vm0, %v205_v40 }
 0x1ad   :  { %v211_v41 = vld [vmem:[#allocation2] sm:$0xff] }
 0x1ae   :  { %261 = vlog2.f32 %v211_v41 }
 0x1b1   :  { %v212_v42 = vld [vmem:[#allocation2 + $0x8] sm:$0xff] }
 0x1b2   :  { %263 = vlog2.f32 %v212_v42 }
 0x1b8   :  { %v262_v43 = vpop.eup %261 }
 0x1b9   :  { %v214_v44 = vmul.f32 0.6931472, %v262_v43 }
 0x1bb   :  { %v217_v45 = vadd.f32 14.285714, %v214_v44 }
 0x1bc   :  { %v264_v46 = vpop.eup %263 }
 0x1bd   :  { %v221_v48 = vsub.f32 %v217_v45, %v219_v47  ;;  %v216_v49 = vmul.f32 0.6931472, %v264_v46 }
 0x1bf   :  { %227 = vst.msk [vmem:[%s379_s2] sm:$0xff] %vm43_vm0, %v221_v48  ;;  %v218_v50 = vadd.f32 14.285714, %v216_v49 }
 0x1c1   :  { %v222_v52 = vsub.f32 %v218_v50, %v220_v51 }
 0x1c3   :  { %228 = vst.msk [vmem:[%s379_s2 + $0x8] sm:$0xff] %vm43_vm0, %v222_v52 }
 0x1c4   :  { %233 = vsyncpa [#allocation5], 1 }
 0x1c5   :  { %234 = vsyncpa [#allocation7], 1 }

</bundles_post_ra>
